<compile_context>
chip_gen: v5e
topology: v5e:2x2
jax: 0.10.0
libtpu: 0.0.40
codegen_flags: <defaults>
</compile_context>

<pallas_src>
import numpy as np

import jax
import jax.numpy as jnp
from jax.experimental import pallas as pl
from jax.experimental.pallas import tpu as pltpu

_MEAN = np.array([0.485, 0.456, 0.406], dtype=np.float32)
_STD = np.array([0.229, 0.224, 0.225], dtype=np.float32)
_DYNAMIC_RANGE = 255.0


def _bilinear_taps(out_size, in_size):
    """Half-pixel-center (align_corners=False) bilinear taps: lo/hi index + weights."""
    scale = in_size / out_size
    dst = np.arange(out_size, dtype=np.float64)
    src = np.clip((dst + 0.5) * scale - 0.5, 0.0, in_size - 1)
    lo = np.floor(src).astype(np.int64)
    hi = np.minimum(lo + 1, in_size - 1)
    w_hi = (src - lo).astype(np.float32)
    w_lo = (1.0 - w_hi).astype(np.float32)
    return lo, hi, w_lo, w_hi


def _bilinear_matrix_np(out_size, in_size):
    """Dense interpolation matrix M (out, in): resized = M @ src (identity if equal)."""
    lo, hi, w_lo, w_hi = _bilinear_taps(out_size, in_size)
    rows = np.arange(out_size)
    m = np.zeros((out_size, in_size), np.float32)
    m[rows, lo] += w_lo
    m[rows, hi] += w_hi
    return m


def _plan_row_bands(h_out, h_in, tile_h, sublane):
    """Per-band compact row-interpolation strips + input row-block index tables.

    Each band of `tile_h` output rows reads at most two consecutive input-row
    blocks of `ib` rows (ib >= widest band span, sublane-aligned). strips_hi[t]
    is all-zero (and blk1[t] aliased to blk0[t]) when one block suffices.
    """
    lo, hi, w_lo, w_hi = _bilinear_taps(h_out, h_in)
    n_bands = -(-h_out // tile_h)

    span = 1
    for t in range(n_bands):
        r0, r1 = t * tile_h, min((t + 1) * tile_h, h_out)
        span = max(span, int(hi[r0:r1].max()) - int(lo[r0:r1].min()) + 1)
    ib = -(-span // sublane) * sublane
    if ib >= h_in:
        ib = h_in                      # one block covers the whole image height
    n_ib = -(-h_in // ib)

    # Dense matrix, zero padded (rows up to full bands, cols up to whole blocks + 1)
    # so every block-column slice below is in range; padded weights are zero.
    m = np.zeros((n_bands * tile_h, (n_ib + 1) * ib), np.float32)
    rows = np.arange(h_out)
    m[rows, lo] += w_lo
    m[rows, hi] += w_hi

    strips_lo = np.zeros((n_bands, tile_h, ib), np.float32)
    strips_hi = np.zeros((n_bands, tile_h, ib), np.float32)
    blk0 = np.zeros((n_bands,), np.int32)
    blk1 = np.zeros((n_bands,), np.int32)
    for t in range(n_bands):
        r0, r1 = t * tile_h, min((t + 1) * tile_h, h_out)
        b0 = int(lo[r0:r1].min()) // ib
        b1 = min(b0 + 1, n_ib - 1)
        band = m[t * tile_h:(t + 1) * tile_h]
        strips_lo[t] = band[:, b0 * ib:(b0 + 1) * ib]
        if b1 != b0:
            strips_hi[t] = band[:, b1 * ib:(b1 + 1) * ib]
            if not np.any(strips_hi[t]):
                b1 = b0                # band never reaches the second block
        blk0[t], blk1[t] = b0, b1
    return strips_lo, strips_hi, blk0, blk1, ib


def _make_single_kernel(h_in, tile_h, mask_rows):
    """One input row-block per band (upsample / same-res / small images)."""
    def kernel(blk0_ref, inv_ref, bias_ref, img_ref, slo_ref, rxt_ref,
               out_ref, tmp_ref):
        ib, w_in = img_ref.shape[2], img_ref.shape[3]
        s_lo = slo_ref[0]                                  # (TILE_H, IB)  bf16
        if mask_rows:                                      # float inputs only
            t = pl.program_id(1)
            rem0 = h_in - blk0_ref[t] * ib
            row_id = jax.lax.broadcasted_iota(jnp.int32, (ib, w_in), 0)
        for c in range(3):
            p = img_ref[0, c, :, :].astype(jnp.float32)    # in-kernel cast
            if mask_rows:
                p = jnp.where(row_id < rem0, p, 0.0)
            tmp_ref[c * tile_h:(c + 1) * tile_h, :] = jnp.dot(
                s_lo, p.astype(jnp.bfloat16), preferred_element_type=jnp.float32)
        # Fused 3-channel column resize: one MXU pass over rxt per band.
        res = jnp.dot(tmp_ref[...].astype(jnp.bfloat16), rxt_ref[...],
                      preferred_element_type=jnp.float32)  # (3*TILE_H, W_out) f32
        for c in range(3):
            # Fused /255 + Normalize: x * 1/(255*std) + (-mean/std).
            out_ref[0, c, :, :] = (res[c * tile_h:(c + 1) * tile_h, :]
                                   * inv_ref[c] + bias_ref[c])
    return kernel


def _make_dual_kernel(h_in, tile_h, mask_rows):
    """Up to two input row-blocks per band; the second is skipped at runtime
    when the band fits a single block (blk1 == blk0)."""
    def kernel(blk0_ref, blk1_ref, inv_ref, bias_ref,
               img0_ref, img1_ref, slo_ref, shi_ref, rxt_ref,
               out_ref, tmp_ref):
        ib, w_in = img0_ref.shape[2], img0_ref.shape[3]
        t = pl.program_id(1)
        s_lo = slo_ref[0]                                  # (TILE_H, IB)  bf16
        if mask_rows:
            row_id = jax.lax.broadcasted_iota(jnp.int32, (ib, w_in), 0)
            rem0 = h_in - blk0_ref[t] * ib
        for c in range(3):
            p0 = img0_ref[0, c, :, :].astype(jnp.float32)
            if mask_rows:
                p0 = jnp.where(row_id < rem0, p0, 0.0)
            tmp_ref[c * tile_h:(c + 1) * tile_h, :] = jnp.dot(
                s_lo, p0.astype(jnp.bfloat16), preferred_element_type=jnp.float32)

        # Only bands straddling two input row-blocks pay the second stream's
        # cast + matmul (blk1 is aliased to blk0 host-side otherwise).
        @pl.when(blk1_ref[t] != blk0_ref[t])
        def _():
            s_hi = shi_ref[0]
            if mask_rows:
                rem1 = h_in - blk1_ref[t] * ib
            for c in range(3):
                p1 = img1_ref[0, c, :, :].astype(jnp.float32)
                if mask_rows:
                    p1 = jnp.where(row_id < rem1, p1, 0.0)
                tmp_ref[c * tile_h:(c + 1) * tile_h, :] += jnp.dot(
                    s_hi, p1.astype(jnp.bfloat16),
                    preferred_element_type=jnp.float32)

        res = jnp.dot(tmp_ref[...].astype(jnp.bfloat16), rxt_ref[...],
                      preferred_element_type=jnp.float32)
        for c in range(3):
            out_ref[0, c, :, :] = (res[c * tile_h:(c + 1) * tile_h, :]
                                   * inv_ref[c] + bias_ref[c])
    return kernel


def _device_kind():
    try:
        return jax.devices()[0].device_kind.lower()
    except Exception:
        return ""


def _default_tile_h():
    kind = _device_kind()
    # 256-wide MXU generations (v6e / v7x) prefer 256-row bands; v5e's 128-wide
    # MXU is already saturated at 128 and larger bands only add VMEM pressure.
    if "v6" in kind or "v7" in kind:
        return 256
    return 128


def _vmem_capacity_bytes():
    try:
        return int(pltpu.get_tpu_info().vmem_capacity_bytes)
    except Exception:
        return 64 * 1024 * 1024        # conservative (v7x per-TensorCore VMEM)


def fcos_preprocess(img_or_batch, target_resolution=(512, 512), tile_h=None):
    """Pallas equivalent of FcosPreprocessor.forward. Returns (normalized NCHW, scales)."""
    h_out, w_out = target_resolution
    x = jnp.asarray(img_or_batch)
    if x.ndim == 3:
        x = x[None]
    assert x.ndim == 4, "expected 3D image or 4D batch"
    if x.shape[1] != 3 and x.shape[-1] == 3:          # accept channels-last input
        x = jnp.transpose(x, (0, 3, 1, 2))
    b, c, h_in, w_in = x.shape
    assert c == 3 and b > 0, f"b, c, h, w = {(b, c, h_in, w_in)}"
    scale = (1.0, 1.0) if (h_in, w_in) == (h_out, w_out) else (h_in / h_out, w_in / w_out)
    scales = [scale] * b
    # NOTE: no host-side float cast -- the image is DMA'd in its original dtype.

    if tile_h is None:
        tile_h = _default_tile_h()
    tile_h = max(1, min(tile_h, h_out))
    if tile_h < h_out:
        tile_h = max(8, (tile_h // 8) * 8)            # sublane-aligned output bands
    n_bands = -(-h_out // tile_h)

    itemsize = x.dtype.itemsize
    sub = {1: 32, 2: 16}.get(itemsize, 8)             # packed sub-32-bit sublane align
    strips_lo, strips_hi, blk0, blk1, ib = _plan_row_bands(h_out, h_in, tile_h, sub)

    single_stream = bool(np.all(blk0 == blk1))
    # Mask padded rows of the last (partial) input block only for float inputs:
    # integer OOB garbage casts to finite values that the zero weights annihilate.
    mask_rows = (h_in % ib != 0) and bool(jnp.issubdtype(x.dtype, jnp.floating))

    # bf16 weights (f32 accumulation in-kernel): ~3-4x MXU throughput, half VMEM.
    slo_bf = jnp.asarray(strips_lo, dtype=jnp.bfloat16)
    shi_bf = jnp.asarray(strips_hi, dtype=jnp.bfloat16)
    rxt_bf = jnp.asarray(_bilinear_matrix_np(w_out, w_in).T, dtype=jnp.bfloat16)
    inv_scale = jnp.asarray(1.0 / (_DYNAMIC_RANGE * _STD), jnp.float32)   # fused FMA scale
    bias = jnp.asarray(-_MEAN / _STD, jnp.float32)                        # fused FMA bias

    n_streams = 1 if single_stream else 2
    flops = int(2 * b * n_bands * 3 * tile_h * (n_streams * ib + w_out) * w_in)
    bytes_accessed = int(b * n_bands * n_streams * (3 * ib * w_in * itemsize
                                                    + tile_h * ib * 2)
                         + b * 3 * h_out * w_out * 4 + w_in * w_out * 2)

    # VMEM budget from the actual working set: double-buffered pipelined streams,
    # single-resident rxt, f32 scratch, in-kernel cast/result temporaries + slack.
    img_blk = 3 * ib * w_in * itemsize
    strip_blk = tile_h * ib * 2
    out_blk = 3 * tile_h * w_out * 4
    need = (2 * n_streams * (img_blk + strip_blk) + 2 * out_blk
            + w_in * w_out * 2                       # rxt (resident once)
            + 3 * tile_h * w_in * 4                  # tmp scratch (f32)
            + n_streams * ib * w_in * 4              # cast temporaries
            + 3 * tile_h * w_in * 2 + out_blk)       # tmp bf16 copy + res f32
    vmem_limit = int(min(max(need * 3 // 2 + (4 << 20), 32 << 20),
                         _vmem_capacity_bytes() - (8 << 20)))

    smem_spec = pl.BlockSpec(memory_space=pltpu.MemorySpace.SMEM)
    rxt_spec = pl.BlockSpec(memory_space=pltpu.MemorySpace.VMEM)   # whole, single copy
    out_shape = jax.ShapeDtypeStruct((b, 3, h_out, w_out), jnp.float32)
    scratch = [pltpu.VMEM((3 * tile_h, w_in), jnp.float32)]
    cparams = pltpu.CompilerParams(
        dimension_semantics=("parallel", "parallel"),
        vmem_limit_bytes=vmem_limit)
    cost = pl.CostEstimate(flops=flops, transcendentals=0,
                           bytes_accessed=bytes_accessed)

    if single_stream:
        grid_spec = pltpu.PrefetchScalarGridSpec(
            num_scalar_prefetch=1,                    # blk0 row-block table
            grid=(b, n_bands),
            in_specs=[
                smem_spec,                            # inv_scale (3,)
                smem_spec,                            # bias (3,)
                pl.BlockSpec((1, 3, ib, w_in), lambda bi, ti, b0: (bi, 0, b0[ti], 0)),
                pl.BlockSpec((1, tile_h, ib), lambda bi, ti, b0: (ti, 0, 0)),
                rxt_spec,
            ],
            out_specs=pl.BlockSpec((1, 3, tile_h, w_out),
                                   lambda bi, ti, b0: (bi, 0, ti, 0)),
            scratch_shapes=scratch)
        out = pl.pallas_call(
            _make_single_kernel(h_in, tile_h, mask_rows),
            out_shape=out_shape, grid_spec=grid_spec,
            compiler_params=cparams, cost_estimate=cost,
        )(jnp.asarray(blk0), inv_scale, bias, x, slo_bf, rxt_bf)
    else:
        grid_spec = pltpu.PrefetchScalarGridSpec(
            num_scalar_prefetch=2,                    # blk0, blk1 row-block tables
            grid=(b, n_bands),
            in_specs=[
                smem_spec, smem_spec,
                pl.BlockSpec((1, 3, ib, w_in), lambda bi, ti, b0, b1: (bi, 0, b0[ti], 0)),
                pl.BlockSpec((1, 3, ib, w_in), lambda bi, ti, b0, b1: (bi, 0, b1[ti], 0)),
                pl.BlockSpec((1, tile_h, ib), lambda bi, ti, b0, b1: (ti, 0, 0)),
                pl.BlockSpec((1, tile_h, ib), lambda bi, ti, b0, b1: (ti, 0, 0)),
                rxt_spec,
            ],
            out_specs=pl.BlockSpec((1, 3, tile_h, w_out),
                                   lambda bi, ti, b0, b1: (bi, 0, ti, 0)),
            scratch_shapes=scratch)
        out = pl.pallas_call(
            _make_dual_kernel(h_in, tile_h, mask_rows),
            out_shape=out_shape, grid_spec=grid_spec,
            compiler_params=cparams, cost_estimate=cost,
        )(jnp.asarray(blk0), jnp.asarray(blk1), inv_scale, bias, x, x,
          slo_bf, shi_bf, rxt_bf)
    return out, scales


if __name__ == "__main__":
    key = jax.random.PRNGKey(0)

    # --- Test 1: downscale path (dual-stream kernel + runtime hi-block skip) ---
    # batch=2, 3 channels, uint8 64x48 -> 32x32 target. tile_h=8 gives 4 output
    # bands over 2 input row-blocks (one band straddles both, the rest do not),
    # exercising the scalar-prefetched band tiling, the pl.when skip and the
    # uint8 -> bf16 in-kernel cast path.
    x = jax.random.randint(key, (2, 3, 64, 48), 0, 256, dtype=jnp.int32).astype(jnp.uint8)
    target = (32, 32)
    out, scales = fcos_preprocess(x, target_resolution=target, tile_h=8)
    out = jax.block_until_ready(out)

    # Pure-JAX f32 reference (dense resize matrices + normalize).
    ry = jnp.asarray(_bilinear_matrix_np(target[0], x.shape[2]))
    rx = jnp.asarray(_bilinear_matrix_np(target[1], x.shape[3]))
    resized = jnp.einsum("Oh,bchw,Ww->bcOW", ry, x.astype(jnp.float32), rx)
    mean = jnp.asarray(_MEAN)[None, :, None, None]
    std = jnp.asarray(_STD)[None, :, None, None]
    ref = (resized / _DYNAMIC_RANGE - mean) / std

    assert out.shape == (2, 3, target[0], target[1]) and out.dtype == jnp.float32
    assert scales == [(2.0, 1.5)] * 2
    err = float(jnp.max(jnp.abs(out - ref)))
    # bf16 interpolation weights / intermediates => relaxed tolerance vs f32 ref.
    assert err < 5e-2, f"max abs err = {err}"

    # --- Test 2: same-resolution path (single-stream kernel, identity resize) --
    x2 = jax.random.randint(jax.random.PRNGKey(1), (1, 3, 16, 16), 0, 256,
                            dtype=jnp.int32).astype(jnp.uint8)
    out2, scales2 = fcos_preprocess(x2, target_resolution=(16, 16))
    out2 = jax.block_until_ready(out2)
    ref2 = (x2.astype(jnp.float32) / _DYNAMIC_RANGE - mean) / std
    err2 = float(jnp.max(jnp.abs(out2 - ref2)))
    assert scales2 == [(1.0, 1.0)]
    assert err2 < 1e-3, f"identity max abs err = {err2}"

    print("KERNEL_OK")
</pallas_src>

<mosaic_0001>
module attributes {stable_mosaic.version = 11 : i64} {
  func.func @kernel(%arg0: i32, %arg1: i32, %arg2: memref<4xi32, #tpu.memory_space<smem>>, %arg3: memref<3xf32, #tpu.memory_space<smem>>, %arg4: memref<3xf32, #tpu.memory_space<smem>>, %arg5: memref<1x3x32x48xi8, #tpu.memory_space<vmem>>, %arg6: memref<1x8x32xbf16, #tpu.memory_space<vmem>>, %arg7: memref<48x32xbf16, #tpu.memory_space<vmem>>, %arg8: memref<1x3x8x32xf32, #tpu.memory_space<vmem>>, %arg9: memref<24x48xf32, #tpu.memory_space<vmem>>) attributes {dimension_semantics = [#tpu.dimension_semantics<parallel>, #tpu.dimension_semantics<parallel>], iteration_bounds = array<i64: 2, 4>, scalar_prefetch = 1 : i64, scratch_operands = 1 : i64, tpu.core_type = #tpu.core_type<tc>, window_params = [{transform_indices = @transform_0, window_bounds = array<i64: 3>}, {transform_indices = @transform_1, window_bounds = array<i64: 3>}, {transform_indices = @transform_2, window_bounds = array<i64: 1, 3, 32, 48>}, {transform_indices = @transform_3, window_bounds = array<i64: 1, 8, 32>}, {pipeline_mode = #tpu.pipeline_mode<synchronous>, transform_indices = @transform_4, window_bounds = array<i64: 48, 32>}, {transform_indices = @transform_5, window_bounds = array<i64: 1, 3, 8, 32>}]} {
    %c0 = arith.constant 0 : index
    %c0_0 = arith.constant 0 : index
    %c0_1 = arith.constant 0 : index
    %0 = vector.load %arg6[%c0, %c0_0, %c0_1] : memref<1x8x32xbf16, #tpu.memory_space<vmem>>, vector<1x8x32xbf16>
    %1 = vector.shape_cast %0 : vector<1x8x32xbf16> to vector<8x32xbf16>
    %c0_2 = arith.constant 0 : index
    %c0_3 = arith.constant 0 : index
    %c0_4 = arith.constant 0 : index
    %c0_5 = arith.constant 0 : index
    %2 = vector.load %arg5[%c0_2, %c0_3, %c0_4, %c0_5] : memref<1x3x32x48xi8, #tpu.memory_space<vmem>>, vector<1x1x32x48xi8>
    %3 = vector.shape_cast %2 : vector<1x1x32x48xi8> to vector<32x48xi8>
    %4 = arith.uitofp %3 : vector<32x48xi8> to vector<32x48xf32>
    %5 = arith.truncf %4 : vector<32x48xf32> to vector<32x48xbf16>
    %cst = arith.constant dense<0.000000e+00> : vector<8x48xf32>
    %6 = tpu.matmul %1, %5, %cst {dimension_numbers = #tpu.dot_dimension_numbers<[1], [0], [0], [1], [0, 0, 1, 1], [], []>} : vector<8x32xbf16>, vector<32x48xbf16>, vector<8x48xf32> -> vector<8x48xf32>
    %c0_6 = arith.constant 0 : index
    %c0_7 = arith.constant 0 : index
    %7 = vector.load %arg9[%c0_6, %c0_7] : memref<24x48xf32, #tpu.memory_space<vmem>>, vector<8x48xf32>
    tpu.vector_store %arg9[%c0_6, %c0_7], %6 {strides = array<i32>} : memref<24x48xf32, #tpu.memory_space<vmem>>, vector<8x48xf32>,
    %c0_8 = arith.constant 0 : index
    %c1 = arith.constant 1 : index
    %c0_9 = arith.constant 0 : index
    %c0_10 = arith.constant 0 : index
    %8 = vector.load %arg5[%c0_8, %c1, %c0_9, %c0_10] : memref<1x3x32x48xi8, #tpu.memory_space<vmem>>, vector<1x1x32x48xi8>
    %9 = vector.shape_cast %8 : vector<1x1x32x48xi8> to vector<32x48xi8>
    %10 = arith.uitofp %9 : vector<32x48xi8> to vector<32x48xf32>
    %11 = arith.truncf %10 : vector<32x48xf32> to vector<32x48xbf16>
    %cst_11 = arith.constant dense<0.000000e+00> : vector<8x48xf32>
    %12 = tpu.matmul %1, %11, %cst_11 {dimension_numbers = #tpu.dot_dimension_numbers<[1], [0], [0], [1], [0, 0, 1, 1], [], []>} : vector<8x32xbf16>, vector<32x48xbf16>, vector<8x48xf32> -> vector<8x48xf32>
    %c8 = arith.constant 8 : index
    %c0_12 = arith.constant 0 : index
    %13 = vector.load %arg9[%c8, %c0_12] : memref<24x48xf32, #tpu.memory_space<vmem>>, vector<8x48xf32>
    tpu.vector_store %arg9[%c8, %c0_12], %12 {strides = array<i32>} : memref<24x48xf32, #tpu.memory_space<vmem>>, vector<8x48xf32>,
    %c0_13 = arith.constant 0 : index
    %c2 = arith.constant 2 : index
    %c0_14 = arith.constant 0 : index
    %c0_15 = arith.constant 0 : index
    %14 = vector.load %arg5[%c0_13, %c2, %c0_14, %c0_15] : memref<1x3x32x48xi8, #tpu.memory_space<vmem>>, vector<1x1x32x48xi8>
    %15 = vector.shape_cast %14 : vector<1x1x32x48xi8> to vector<32x48xi8>
    %16 = arith.uitofp %15 : vector<32x48xi8> to vector<32x48xf32>
    %17 = arith.truncf %16 : vector<32x48xf32> to vector<32x48xbf16>
    %cst_16 = arith.constant dense<0.000000e+00> : vector<8x48xf32>
    %18 = tpu.matmul %1, %17, %cst_16 {dimension_numbers = #tpu.dot_dimension_numbers<[1], [0], [0], [1], [0, 0, 1, 1], [], []>} : vector<8x32xbf16>, vector<32x48xbf16>, vector<8x48xf32> -> vector<8x48xf32>
    %c16 = arith.constant 16 : index
    %c0_17 = arith.constant 0 : index
    %19 = vector.load %arg9[%c16, %c0_17] : memref<24x48xf32, #tpu.memory_space<vmem>>, vector<8x48xf32>
    tpu.vector_store %arg9[%c16, %c0_17], %18 {strides = array<i32>} : memref<24x48xf32, #tpu.memory_space<vmem>>, vector<8x48xf32>,
    %c0_18 = arith.constant 0 : index
    %c0_19 = arith.constant 0 : index
    %20 = vector.load %arg9[%c0_18, %c0_19] : memref<24x48xf32, #tpu.memory_space<vmem>>, vector<24x48xf32>
    %21 = arith.truncf %20 : vector<24x48xf32> to vector<24x48xbf16>
    %c0_20 = arith.constant 0 : index
    %c0_21 = arith.constant 0 : index
    %22 = vector.load %arg7[%c0_20, %c0_21] : memref<48x32xbf16, #tpu.memory_space<vmem>>, vector<48x32xbf16>
    %cst_22 = arith.constant dense<0.000000e+00> : vector<24x32xf32>
    %23 = tpu.matmul %21, %22, %cst_22 {dimension_numbers = #tpu.dot_dimension_numbers<[1], [0], [0], [1], [0, 0, 1, 1], [], []>} : vector<24x48xbf16>, vector<48x32xbf16>, vector<24x32xf32> -> vector<24x32xf32>
    %24 = vector.extract_strided_slice %23 {offsets = [0, 0], sizes = [8, 32], strides = [1, 1]} : vector<24x32xf32> to vector<8x32xf32>
    %c0_23 = arith.constant 0 : index
    %25 = memref.load %arg3[%c0_23] : memref<3xf32, #tpu.memory_space<smem>>
    %26 = vector.broadcast %25 : f32 to vector<8x32xf32>
    %27 = arith.mulf %24, %26 : vector<8x32xf32>
    %c0_24 = arith.constant 0 : index
    %28 = memref.load %arg4[%c0_24] : memref<3xf32, #tpu.memory_space<smem>>
    %29 = vector.broadcast %28 : f32 to vector<8x32xf32>
    %30 = arith.addf %27, %29 : vector<8x32xf32>
    %c0_25 = arith.constant 0 : index
    %c0_26 = arith.constant 0 : index
    %c0_27 = arith.constant 0 : index
    %c0_28 = arith.constant 0 : index
    %31 = vector.load %arg8[%c0_25, %c0_26, %c0_27, %c0_28] : memref<1x3x8x32xf32, #tpu.memory_space<vmem>>, vector<1x1x8x32xf32>
    %32 = vector.shape_cast %31 : vector<1x1x8x32xf32> to vector<8x32xf32>
    %33 = vector.shape_cast %30 : vector<8x32xf32> to vector<1x1x8x32xf32>
    tpu.vector_store %arg8[%c0_25, %c0_26, %c0_27, %c0_28], %33 {strides = array<i32>} : memref<1x3x8x32xf32, #tpu.memory_space<vmem>>, vector<1x1x8x32xf32>,
    %34 = vector.extract_strided_slice %23 {offsets = [8, 0], sizes = [8, 32], strides = [1, 1]} : vector<24x32xf32> to vector<8x32xf32>
    %c1_29 = arith.constant 1 : index
    %35 = memref.load %arg3[%c1_29] : memref<3xf32, #tpu.memory_space<smem>>
    %36 = vector.broadcast %35 : f32 to vector<8x32xf32>
    %37 = arith.mulf %34, %36 : vector<8x32xf32>
    %c1_30 = arith.constant 1 : index
    %38 = memref.load %arg4[%c1_30] : memref<3xf32, #tpu.memory_space<smem>>
    %39 = vector.broadcast %38 : f32 to vector<8x32xf32>
    %40 = arith.addf %37, %39 : vector<8x32xf32>
    %c0_31 = arith.constant 0 : index
    %c1_32 = arith.constant 1 : index
    %c0_33 = arith.constant 0 : index
    %c0_34 = arith.constant 0 : index
    %41 = vector.load %arg8[%c0_31, %c1_32, %c0_33, %c0_34] : memref<1x3x8x32xf32, #tpu.memory_space<vmem>>, vector<1x1x8x32xf32>
    %42 = vector.shape_cast %41 : vector<1x1x8x32xf32> to vector<8x32xf32>
    %43 = vector.shape_cast %40 : vector<8x32xf32> to vector<1x1x8x32xf32>
    tpu.vector_store %arg8[%c0_31, %c1_32, %c0_33, %c0_34], %43 {strides = array<i32>} : memref<1x3x8x32xf32, #tpu.memory_space<vmem>>, vector<1x1x8x32xf32>,
    %44 = vector.extract_strided_slice %23 {offsets = [16, 0], sizes = [8, 32], strides = [1, 1]} : vector<24x32xf32> to vector<8x32xf32>
    %c2_35 = arith.constant 2 : index
    %45 = memref.load %arg3[%c2_35] : memref<3xf32, #tpu.memory_space<smem>>
    %46 = vector.broadcast %45 : f32 to vector<8x32xf32>
    %47 = arith.mulf %44, %46 : vector<8x32xf32>
    %c2_36 = arith.constant 2 : index
    %48 = memref.load %arg4[%c2_36] : memref<3xf32, #tpu.memory_space<smem>>
    %49 = vector.broadcast %48 : f32 to vector<8x32xf32>
    %50 = arith.addf %47, %49 : vector<8x32xf32>
    %c0_37 = arith.constant 0 : index
    %c2_38 = arith.constant 2 : index
    %c0_39 = arith.constant 0 : index
    %c0_40 = arith.constant 0 : index
    %51 = vector.load %arg8[%c0_37, %c2_38, %c0_39, %c0_40] : memref<1x3x8x32xf32, #tpu.memory_space<vmem>>, vector<1x1x8x32xf32>
    %52 = vector.shape_cast %51 : vector<1x1x8x32xf32> to vector<8x32xf32>
    %53 = vector.shape_cast %50 : vector<8x32xf32> to vector<1x1x8x32xf32>
    tpu.vector_store %arg8[%c0_37, %c2_38, %c0_39, %c0_40], %53 {strides = array<i32>} : memref<1x3x8x32xf32, #tpu.memory_space<vmem>>, vector<1x1x8x32xf32>,
    return
  }
  func.func @transform_0(%arg0: i32, %arg1: i32, %arg2: memref<4xi32, #tpu.memory_space<smem>>) -> i32 {
    %c0_i32 = arith.constant 0 : i32
    %c0_i32_0 = arith.constant 0 : i32
    return %c0_i32 : i32
  }
  func.func @transform_1(%arg0: i32, %arg1: i32, %arg2: memref<4xi32, #tpu.memory_space<smem>>) -> i32 {
    %c0_i32 = arith.constant 0 : i32
    %c0_i32_0 = arith.constant 0 : i32
    return %c0_i32 : i32
  }
  func.func @transform_2(%arg0: i32, %arg1: i32, %arg2: memref<4xi32, #tpu.memory_space<smem>>) -> (i32, i32, i32, i32) {
    %0 = arith.index_cast %arg1 : i32 to index
    %1 = memref.load %arg2[%0] : memref<4xi32, #tpu.memory_space<smem>>
    %c0_i32 = arith.constant 0 : i32
    %c0_i32_0 = arith.constant 0 : i32
    %c0_i32_1 = arith.constant 0 : i32
    return %arg0, %c0_i32, %1, %c0_i32_0 : i32, i32, i32, i32
  }
  func.func @transform_3(%arg0: i32, %arg1: i32, %arg2: memref<4xi32, #tpu.memory_space<smem>>) -> (i32, i32, i32) {
    %c0_i32 = arith.constant 0 : i32
    %c0_i32_0 = arith.constant 0 : i32
    %c0_i32_1 = arith.constant 0 : i32
    return %arg1, %c0_i32, %c0_i32_0 : i32, i32, i32
  }
  func.func @transform_4(%arg0: i32, %arg1: i32, %arg2: memref<4xi32, #tpu.memory_space<smem>>) -> (i32, i32) {
    %c0_i32 = arith.constant 0 : i32
    %c0_i32_0 = arith.constant 0 : i32
    %c0_i32_1 = arith.constant 0 : i32
    return %c0_i32, %c0_i32_0 : i32, i32
  }
  func.func @transform_5(%arg0: i32, %arg1: i32, %arg2: memref<4xi32, #tpu.memory_space<smem>>) -> (i32, i32, i32, i32) {
    %c0_i32 = arith.constant 0 : i32
    %c0_i32_0 = arith.constant 0 : i32
    %c0_i32_1 = arith.constant 0 : i32
    return %arg0, %c0_i32, %arg1, %c0_i32_0 : i32, i32, i32, i32
  }
}

</mosaic_0001>

<bundles_post_ra>
// kernel: tpu_custom_call.1
= control target key start
LH: loop header
LB: loop body
LE: loop exit
PB: predicated region body
PF: predicated region fallthrough
CT: control target
= control target key end

     0   :  { %s973_s24 = smov [#allocation4]   ;;  %s1235_s0 = inlined_call_operand.vmem [shape: s32[4], index: 0, kind: input, shape index: {}]   ;;  %s1236_s1 = inlined_call_operand.vmem [shape: f32[3], index: 1, kind: input, shape index: {}]   ;;  %s1237_s2 = inlined_call_operand.vmem [shape: f32[3], index: 2, kind: input, shape index: {}]   ;;  %s1238_s3 = inlined_call_operand.vmem [shape: u8[2,3,64,48], index: 3, kind: input, shape index: {}]   ;;  %s1239_s4 = inlined_call_operand.vmem [shape: bf16[4,8,32], index: 4, kind: input, shape index: {}]   ;;  %s1240_s5 = inlined_call_operand.vmem [shape: bf16[48,32], index: 5, kind: input, shape index: {}]   ;;  %s1241_s6 = inlined_call_operand.hbm [shape: f32[2,3,32,32], index: 6, kind: output, shape index: {}]  }
   0x1   :  { %1246 = sst [smem:[#allocation19_spill]] %s1236_s1  ;;  %s12_s23 = sshll.u32 %s1235_s0, 4  ;;  %s13_s23 = int_to_ptr.vmem [resolvable:$true] %s12_s23 }
   0x2   :  { %1247 = sst [smem:[#allocation20_spill]] %s1237_s2 }
   0x3   :  { %1248 = sst [smem:[#allocation21_spill]] %s1241_s6 }
   0x4   :  { %15 = dma.vmem_to_smem %s13_s23, 16, %s973_s24, [#allocation3] }
   0x5   :  { %919 = dma.done.wait [#allocation3], 16 }
   0x6   :  { %920 = vsyncadd [#allocation3], 4294967280 }
   0x7   :  { %18 = sfence }
   0x8   :  { %19 = vsyncpa [#allocation7], 0 }
   0x9   :  { %20 = vsyncpa [#allocation9], 0 }
   0xa   :  { %21 = vsyncpa [#allocation6], 0 }
   0xb   :  { %23 = vsyncpa [#allocation6 + $0x1], 0  ;;  %s1017_s25 = smov 0   ;;  %s1019_s26 = smov 0  }
   0xc   :  { %s1021_s27 = smov 0   ;;  %s1023_s28 = smov 0  }
   0xd   :  { %s1025_s29 = smov 0   ;;  %s1027_s0 = smov 0  }
   0xe   :  { %s1029_s30 = smov 0   ;;  %s1031_s7 = smov 0  }
   0xf   :  { %s1033_s8 = smov 0   ;;  %s1035_s9 = smov 0  }
  0x10 LB: > { %s1244_s10 = sadd.s32 4294967295, %s971_s9   ;;  %s648_s11 = sadd.s32 4294967294, %s971_s9   ;;  %s971_s9 = sphi %s1035_s9, %s29_s9   ;;  %s967_s8 = sphi %s1033_s8, %s1273_s8   ;;  %s963_s7 = sphi %s1031_s7, %s1272_s7   ;;  %s959_s30 = sphi %s1029_s30, %s1271_s30   ;;  %s955_s0 = sphi %s1027_s0, %s1270_s0   ;;  %s951_s29 = sphi %s1025_s29, %s1269_s29   ;;  %s947_s28 = sphi %s1023_s28, %s1268_s28   ;;  %s943_s27 = sphi %s1021_s27, %s1267_s27   ;;  %s939_s26 = sphi %s1019_s26, %s1266_s26   ;;  %s935_s25 = sphi %s1017_s25, %s1265_s25  }
  0x11   : > { %s38_s12 = sadd.s32 1, %s963_s7  ;;  %s41_s13 = sadd.s32 1, %s967_s8 }
  0x12   : > { %p39_p0 = scmp.ge.s32.totalorder %s38_s12, 4  ;;  %s87_s14 = sld [smem:[#allocation4 + %s963_s7]] }
  0x13   : > { %s94_s15 = sadd.s32 1, %s951_s29  ;;  %p101_p1 = scmp.ne.s32.totalorder %s951_s29, %s947_s28 }
  0x14   : > { %s1275_s12 = smov (%p39_p0, %s38_s12), 0  ;;  %s1277_s13 = smov (!%p39_p0, %s41_s13), %s967_s8 }
  0x15   : > { %1249 = sst [smem:[#allocation16_spill]] %s1275_s12  ;;  %p102_p2 = scmp.eq.s32.totalorder %s971_s9, 0 }
  0x16   : > { %s88_s16 = sld [smem:[#allocation4 + %s1275_s12]]  ;;  %p43_p3 = scmp.ge.s32.totalorder %s1277_s13, 2 }
  0x17   : > { %s165_s17 = ssub.s32 %s963_s7, %s1275_s12  ;;  %p1082_p4 = por %p102_p2, %p101_p1 }
  0x18   : > { %s169_s19 = sadd.s32 1, %s943_s27  ;;  %s1279_s13 = smov (%p43_p3, %s1277_s13), 0 }
  0x19   : > { %1251 = sst [smem:[#allocation17_spill]] %s1279_s13  ;;  %p179_p5 = scmp.ne.s32.totalorder %s943_s27, %s939_s26 }
  0x1a   : > { %p180_p6 = scmp.eq.s32.totalorder %s1244_s10, 7  ;;  %s89_s20 = ssub.s32 %s967_s8, %s1279_s13 }
  0x1b   : > { %p185_p7 = scmp.ne.s32.totalorder %s939_s26, %s935_s25  ;;  %s166_s22 = sor.u32 %s165_s17, %s89_s20 }
  0x1c   : > { %s90_s21 = ssub.s32 %s87_s14, %s88_s16  ;;  %p167_p8 = scmp.eq.s32.totalorder %s166_s22, 0 }
  0x1d   : > { %s91_s23 = sor.u32 %s90_s21, %s89_s20  ;;  %p1097_p10 = por %p180_p6, %p179_p5 }
  0x1e   : > { %p92_p9 = scmp.eq.s32.totalorder %s91_s23, 0  ;;  %p186_p11 = scmp.eq.s32.totalorder %s648_s11, 7 }
  0x1f   : > { %s1102_s12 = scalar_select %p167_p8, %s943_s27, %s169_s19  }
  0x20   : > { %s1105_s6 = scalar_select %p92_p9, %s951_s29, %s94_s15  }
  0x21   : > { %p649_p12 = scmp.ge.s32.totalorder %s971_s9, 1  ;;  %p193_p13 = scmp.lt.s32.totalorder %s971_s9, 9 }
  0x22   : > { %1253 = sst [smem:[#allocation18_spill]] %s1105_s6  ;;  %p1109_p0 = por %p186_p11, %p185_p7 }
  0x23   : > { %s1255_s14 = sadd.s32 4294967295, %s971_s9   ;;  %p1119_p2 = pnand %p649_p12, %p193_p13 }
  0x24   : > { %p1115_p1 = scmp.eq.s32.totalorder %s1255_s14, 0  ;;  %s1258_s1 = sld [smem:[#allocation19_spill]] }
  0x25   : > { %p707_p3 = pneg %p1119_p2  ;;  %s1259_s2 = sld [smem:[#allocation20_spill]] }
  0x26   : > { %s974_s23 = smov [#allocation5]   ;;  %s975_s14 = smov [#allocation8]  }
  0x27   : > { %p708_p5 = pnand %p1115_p1, %p707_p3  ;;  %p652_p6 = scmp.ge.s32.totalorder %s971_s9, 8 }
  0x29   : > { %225 = sbr.rel (%p652_p6) target bundleno = 60 (0x3c), region = 28 }
  0x2a   : > { %s205_s11 = sshll.u32 %s1258_s1, 4  ;;  %s206_s11 = int_to_ptr.vmem [resolvable:$true] %s205_s11 }
  0x2b   : > { %s215_s22 = sshll.u32 %s1259_s2, 4  ;;  %s216_s22 = int_to_ptr.vmem [resolvable:$true] %s215_s22 }
  0x2c   : > { %710 = dma.vmem_to_smem (!%p708_p5), %s206_s11, 16, %s974_s23, [#allocation7]  }
  0x2d   : > { %713 = dma.vmem_to_smem (!%p708_p5), %s216_s22, 16, %s975_s14, [#allocation9]  }
  0x2e   : > { %228 = sbr.rel (!%p1082_p4) target bundleno = 60 (0x3c), region = 32  ;;  %s230_s19 = sand.u32 (%p1082_p4), 1, %s951_s29  }
  0x2f   : > { %s233_s15 = sld [smem:[#allocation4 + %s963_s7]] (%p1082_p4)  ;;  %s693_s20 = smul.u32 (%p1082_p4), 6, %s967_s8 }
  0x30   : > { %s692_s21 = smul.u32 (%p1082_p4), 24, %s230_s19 }
  0x32   : > { %s232_s22 = scalar_lea.vmem (%p1082_p4), [#allocation10], %s692_s21 }
  0x35   : > { %s235_s1 = sadd.s32 %s693_s20, %s233_s15 }
  0x36   : > { %s653_s2 = sshll.u32 %s235_s1, 3 }
  0x37   : > { %s237_s11 = scalar_lea.vmem %s1238_s3, %s653_s2 }
  0x38   : > { %v270_v0 = vld [vmem:[%s237_s11] sm:$0xff]  ;;  %v272_v1 = vld [vmem:[%s237_s11 + $0x10] sm:$0xff] }
  0x39   : > { %v274_v2 = vld [vmem:[%s237_s11 + $0x20] sm:$0xff]  ;;  %271 = vst [vmem:[%s232_s22] sm:$0xff] %v270_v0 }
  0x3a   : > { %273 = vst [vmem:[%s232_s22 + $0x8] sm:$0xff] %v272_v1 }
  0x3b   : > { %275 = vst [vmem:[%s232_s22 + $0x10] sm:$0xff] %v274_v2 }
  0x3c PF: > { %291 = sbr.rel (%p1119_p2) target bundleno = 375 (0x177), region = 74 }
  0x41   : > { %922 = dma.done.wait (%p1115_p1), [#allocation7], 16  }
  0x42   : > { %924 = vsyncadd (%p1115_p1), [#allocation7], 4294967280 }
  0x43   : > { %926 = dma.done.wait (%p1115_p1), [#allocation9], 16  }
  0x44   : > { %928 = vsyncadd (%p1115_p1), [#allocation9], 4294967280  ;;  %s304_s1 = sand.u32 1, %s947_s28  }
  0x45   : > { %s694_s2 = smul.u32 24, %s304_s1 }
  0x47   : > { %s306_s6 = scalar_lea.vmem [#allocation10], %s694_s2 }
  0x48   : > { %310 = sfence }
  0x49   : > { %v343_v3 = vld [vmem:[%s306_s6] sm:$0xff]  ;;  %v659_v4 = vld [vmem:[%s306_s6 + $0x8] sm:$0xff]  ;;  %v661_v5 = vld [vmem:[%s306_s6 + $0x10] sm:$0xff]  ;;  %p337_p4 = scmp.lt.s32.totalorder %s955_s0, 3  ;;  %vm358_vm0 = vcmask 261120   ;;  %vm375_vm1 = vcmask 392192  }
  0x4a   : > { %v346_v6 = vunpack.c.2.s8 %v343_v3  ;;  %v347_v7 = vunpack.c.3.s8 %v343_v3  ;;  %v381_v8 = vunpack.c.2.s8 %v659_v4  ;;  %v382_v9 = vunpack.c.3.s8 %v659_v4  ;;  %v688_v49 = vld [vmem:[%s1240_s5 + $0x10] sm:$0xff]  ;;  %v687_v50 = vld [vmem:[%s1240_s5 + $0x8] sm:$0xff]  ;;  %v686_v51 = vld [vmem:[%s1240_s5] sm:$0xff]  ;;  %s490_s11 = sld [smem:[#allocation5]]  ;;  %s333_s1 = sand.u32 1, %s939_s26  }
  0x4b   : > { %v411_v10 = vunpack.c.2.s8 %v661_v5  ;;  %v412_v11 = vunpack.c.3.s8 %v661_v5  ;;  %v344_v12 = vunpack.c.0.s8 %v343_v3  ;;  %v345_v13 = vunpack.c.1.s8 %v343_v3  ;;  %s1155_s28 = scalar_select %p337_p4, %s955_s0, 3  ;;  %689 = vmatpush.bf16.msra.mxu3 %v688_v49 }
  0x4c   : > { %v350_v14 = vand.u32 255, %v346_v6  ;;  %v351_v15 = vand.u32 255, %v347_v7  ;;  %v385_v16 = vand.u32 255, %v381_v8  ;;  %v386_v17 = vand.u32 255, %v382_v9  ;;  %s493_s22 = sld [smem:[#allocation8]]  ;;  %s695_s2 = smul.u32 24, %s333_s1 }
  0x4d   : > { %v415_v18 = vand.u32 255, %v411_v10  ;;  %v416_v19 = vand.u32 255, %v412_v11  ;;  %v348_v20 = vand.u32 255, %v344_v12  ;;  %v349_v21 = vand.u32 255, %v345_v13  ;;  %s657_s13 = sshll.u32 %s1155_s28, 2  ;;  %s677_s6 = sld [smem:[#allocation5 + $0x1]] }
  0x4e   : > { %v354_v22 = vcvt.s32.f32 %v350_v14  ;;  %v355_v23 = vcvt.s32.f32 %v351_v15  ;;  %v389_v24 = vcvt.s32.f32 %v385_v16  ;;  %v390_v25 = vcvt.s32.f32 %v386_v17  ;;  %s340_s17 = scalar_lea.vmem %s1239_s4, %s657_s13  ;;  %s696_s28 = smul.u32 12, %s959_s30 }
  0x4f   : > { %v419_v26 = vcvt.s32.f32 %v415_v18  ;;  %v420_v27 = vcvt.s32.f32 %v416_v19  ;;  %v352_v28 = vcvt.s32.f32 %v348_v20  ;;  %v353_v29 = vcvt.s32.f32 %v349_v21  ;;  %v342_v47 = vld [vmem:[%s340_s17] sm:$0xf]  ;;  %690 = vmatpush.bf16.msra.mxu3 %v687_v50  ;;  %s678_s13 = sld [smem:[#allocation8 + $0x1]]  ;;  %s335_s17 = scalar_lea.vmem [#allocation11], %s695_s2 }
  0x50   : > { %v357_v30 = vpack.c.bf16 %v355_v23, %v354_v22  ;;  %v392_v31 = vpack.c.bf16 %v390_v25, %v389_v24  ;;  %v379_v32 = vunpack.c.0.s8 %v659_v4  ;;  %v380_v33 = vunpack.c.1.s8 %v659_v4  ;;  %s680_s18 = sld [smem:[#allocation5 + $0x2]]  ;;  %s524_s16 = sadd.s32 %s955_s0, %s696_s28 }
  0x51   : > { %v422_v34 = vpack.c.bf16 %v420_v27, %v419_v26  ;;  %v409_v35 = vunpack.c.0.s8 %v661_v5  ;;  %v410_v36 = vunpack.c.1.s8 %v661_v5  ;;  %v356_v37 = vpack.c.bf16 %v353_v29, %v352_v28  ;;  %s681_s23 = sld [smem:[#allocation8 + $0x2]]  ;;  %s683_s14 = sshll.u32 %s524_s16, 3 }
  0x52   : > { %368 = vmatpush.bf16.msra.mxu0 %v357_v30  ;;  %399 = vmatpush.bf16.msra.mxu1 %v392_v31  ;;  %v383_v38 = vand.u32 255, %v379_v32  ;;  %v384_v39 = vand.u32 255, %v380_v33  ;;  %v491_v63 = vstv %s490_s11  ;;  %v494_v1 = vstv %s493_s22  ;;  %s1260_s30 = sld [smem:[#allocation21_spill]]  ;;  %s527_s11 = sshll.u32 %s335_s17, 4  ;;  %s528_s11 = int_to_ptr.vmem [resolvable:$true] %s527_s11 }
  0x53   : > { %429 = vmatpush.bf16.msra.mxu2 %v422_v34  ;;  %v413_v40 = vand.u32 255, %v409_v35  ;;  %v414_v41 = vand.u32 255, %v410_v36  ;;  %691 = vmatpush.bf16.msra.mxu3 %v686_v51  ;;  %v498_v4 = vstv %s677_s6  ;;  %s514_s0 = scalar_lea.sflag [#allocation6], %s333_s1 }
  0x54   : > { %v387_v42 = vcvt.s32.f32 %v383_v38  ;;  %v388_v43 = vcvt.s32.f32 %v384_v39 }
  0x55   : > { %v417_v44 = vcvt.s32.f32 %v413_v40  ;;  %v418_v45 = vcvt.s32.f32 %v414_v41  ;;  %v501_v6 = vstv %s678_s13 }
  0x56   : > { %369 = vmatpush.bf16.msra.mxu0 %v356_v37  ;;  %v391_v46 = vpack.c.bf16 %v388_v43, %v387_v42  ;;  %v506_v9 = vstv %s680_s18 }
  0x57   : > { %v421_v48 = vpack.c.bf16 %v418_v45, %v417_v44  ;;  %v509_v11 = vstv %s681_s23 }
  0x58   : > { %400 = vmatpush.bf16.msra.mxu1 %v391_v46  ;;  %s1261_s20 = smov %s1260_s30  ;;  %s526_s21 = scalar_lea.hbm %s1260_s30, %s683_s14 }
  0x59   : > { %430 = vmatpush.bf16.msra.mxu2 %v421_v48  ;;  %658 = vmatmul.msk.bf16.vlgmr.msra.gmra.mxu0 %vm358_vm0, %v342_v47  ;;  %s529_s22 = sshll.u32 %s526_s21, 4  ;;  %s871_s18 = scalar_lea.hbm %s1261_s20, 192  ;;  %s530_s22 = int_to_ptr.hbm [resolvable:$true] %s529_s22 }
  0x5a   : > { %477 = vmatpush.bf16.msrb.mxu0 %v688_v49  ;;  %s865_s2 = sshra.s32 %s530_s22, 4  ;;  %s866_s2 = int_to_ptr.hbm [resolvable:$true] %s865_s2 }
  0x5b   : > { %660 = vmatmul.msk.bf16.vlgmr.msra.gmra.mxu1 %vm358_vm0, %v342_v47  ;;  %s867_s6 = scalar_lea.hbm %s866_s2, 24  ;;  %p872_p11 = scmp.lt.s32.totalorder %s866_s2, %s1261_s20 }
  0x5c   : > { %662 = vmatmul.msk.bf16.vlgmr.msra.gmra.mxu2 %vm358_vm0, %v342_v47  ;;  %p868_p7 = scmp.ne.s32.totalorder %s866_s2, %s867_s6  ;;  %p873_p12 = scmp.lt.s32.totalorder %s871_s18, %s867_s6 }
  0x5e   : > { %478 = vmatpush.bf16.msrb.mxu0 %v687_v50  ;;  %p869_p8 = pnand %p868_p7, %p1097_p10  ;;  %p874_p13 = por %p873_p12, %p872_p11 }
  0x60   : > { %p870_p9 = pneg %p869_p8 }
  0x62   : > { %479 = vmatpush.bf16.msrb.mxu0 %v686_v51  ;;  %p875_p1 = pnand %p874_p13, %p870_p9 }
  0xd6   : > { %v371_v52 = vpop.f32.mrf.mxu0 }
  0xd7   : > { %376 = vst.msk [vmem:[#allocation2] sm:$0xff] %vm375_vm1, %v371_v52 }
  0xd8   : > { %v402_v53 = vpop.f32.mrf.mxu1 }
  0xd9   : > { %406 = vst.msk [vmem:[#allocation2 + $0x8] sm:$0xff] %vm375_vm1, %v402_v53 }
  0xde   : > { %v373_v54 = vpop.f32.mrf.mxu0  ;;  %v437_v55 = vld [vmem:[#allocation2] sm:$0xff] }
  0xdf   : > { %v432_v56 = vpop.f32.mrf.mxu2 }
  0xe0   : > { %436 = vst.msk [vmem:[#allocation2 + $0x10] sm:$0xff] %vm375_vm1, %v432_v56  ;;  %v404_v57 = vpop.f32.mrf.mxu1  ;;  %v438_v58 = vld [vmem:[#allocation2 + $0x8] sm:$0xff] }
  0xe1   : > { %v440_v59 = vpack.c.bf16 %v438_v58, %v437_v55 }
  0xe3   : > { %675 = vmatmul.msk.bf16.vlgmr.msrb.gmra.mxu0 %vm375_vm1, %v440_v59 }
  0xe7   : > { %v434_v60 = vpop.f32.mrf.mxu2  ;;  %v439_v61 = vld [vmem:[#allocation2 + $0x10] sm:$0xff] }
  0xe8   : > { %v441_v62 = vpack.c.bf16 %v439_v61, %v439_v61 }
  0xea   : > { %676 = vmatmul.msk.bf16.vlgmr.msra.gmra.mxu3 %vm375_vm1, %v441_v62 }
 0x160   : > { %v481_v0 = vpop.f32.mrf.mxu0 }
 0x161   : > { %v492_v2 = vmul.f32 %v491_v63, %v481_v0 }
 0x163   : > { %v495_v3 = vadd.f32 %v494_v1, %v492_v2 }
 0x165   : > { %496 = vst.msk [vmem:[%s335_s17] sm:$0xff] %vm358_vm0, %v495_v3 }
 0x168   : > { %v483_v5 = vpop.f32.mrf.mxu0 }
 0x169   : > { %v499_v7 = vmul.f32 %v498_v4, %v483_v5 }
 0x16b   : > { %v502_v8 = vadd.f32 %v501_v6, %v499_v7 }
 0x16d   : > { %679 = vst.msk [vmem:[%s335_s17 + $0x8] sm:$0xff] %vm358_vm0, %v502_v8  ;;  %v486_v10 = vpop.f32.mrf.mxu3 }
 0x16e   : > { %v507_v12 = vmul.f32 %v506_v9, %v486_v10 }
 0x170   : > { %v510_v13 = vadd.f32 %v509_v11, %v507_v12 }
 0x172   : > { %682 = vst.msk [vmem:[%s335_s17 + $0x10] sm:$0xff] %vm358_vm0, %v510_v13 }
 0x173   : > { %878 = shalt.err (!%p875_p1)
}
 0x174   : > { %s976_s1 = smov 128   ;;  %s977_s17 = smov 512  }
 0x175   : > { %s978_s14 = smov 8   ;;  %v488_v14 = vpop.f32.mrf.mxu3 }
 0x176   : > { %705 = dma.vmem_to_hbm [thread:$0]  (%p1097_p10), %s528_s11, 384, %s530_s22, %s514_s0, %s976_s1, %s977_s17, %s978_s14  }
 0x177 PF: > { %p722_p2 = scmp.ge.s32.totalorder %s971_s9, 2  ;;  %s544_s19 = sand.u32 1, %s935_s25  }
 0x178   : > { %s545_s15 = scalar_lea.sflag [#allocation6], %s544_s19 }
 0x179   : > { %p715_p3 = pnand %p722_p2, %p1109_p0 }
 0x17b   : > { %p716_p5 = pneg %p715_p3 }
 0x17d   : > { %930 = dma.done.wait (%p716_p5), %s545_s15, 384  }
 0x17e   : > { %932 = vsyncadd (%p716_p5), %s545_s15, 4294966912  ;;  %s29_s9 = sadd.s32 1, %s971_s9   ;;  %s1262_s24 = sld [smem:[#allocation18_spill]] }
 0x17f   : > { %p26_p6 = scmp.ge.s32.totalorder %s29_s9, 10   ;;  %s1263_s21 = sld [smem:[#allocation16_spill]] }
 0x180   : > { %s1264_s11 = sld [smem:[#allocation17_spill]]  ;;  %s1265_s25 = smov %s939_s26 }
 0x181   : > { %s1266_s26 = smov %s943_s27  ;;  %s1267_s27 = smov %s1102_s12 }
 0x182   : > { %s1268_s28 = smov %s951_s29  ;;  %s1270_s0 = smov %s963_s7 }
 0x183   : > { %s1271_s30 = smov %s967_s8  ;;  %28 = sbr.rel (!%p26_p6) target bundleno = 16 (0x10), region = 134 }
 0x184   : > { %s1269_s29 = smov %s1262_s24 }
 0x185   : > { %s1272_s7 = smov %s1263_s21 }
 0x186   : > { %s1273_s8 = smov %s1264_s11 }
 0x188   :  { %551 = vsyncpa [#allocation6], 1 }
 0x189   :  { %553 = vsyncpa [#allocation6 + $0x1], 1 }
 0x18a   :  { %554 = vsyncpa [#allocation7], 1 }
 0x18b   :  { %556 = vsyncpa [#allocation7 + $0x1], 1 }
 0x18c   :  { %557 = vsyncpa [#allocation9], 1 }

</bundles_post_ra>
